<compile_context>
chip_gen: v6e
topology: v6e:2x2x1
jax: 0.10.0
libtpu: 0.0.40
codegen_flags: <defaults>
</compile_context>

<pallas_src>
from functools import partial

import jax
import jax.numpy as jnp
from jax.experimental import pallas as pl
from jax.experimental.pallas import tpu as pltpu

D_IN = 28 * 14          # 392
D_HEAD = 128
SEQ = 2                 # head in_features = 128*2  =>  sequence length is 2
N_OUT = 10


def _round_up(n, m):
    return ((n + m - 1) // m) * m


def witmem_kernel(x_ref, wqkv_ref, bqkv_ref, wh0_ref, wh1_ref, bh_ref, out_ref):
    """One batch tile of the fused QKV projection + 2x2 attention + head.

    x_ref    : [TB, 2, 392] f32   (raw input tile straight from HBM)
    wqkv_ref : [392, 384]   bf16  (resident across grid steps)
    bqkv_ref : [1, 384]     f32
    wh0_ref  : [128, 10]    f32   (head weight rows   0:128 -> seq pos 0)
    wh1_ref  : [128, 10]    f32   (head weight rows 128:256 -> seq pos 1)
    bh_ref   : [1, 10]      f32
    out_ref  : [TB, 10]     f32
    """
    # Seq split + bf16 cast in-kernel (VPU work, hidden under the input DMA).
    x0 = x_ref[:, 0, :].astype(jnp.bfloat16)          # [TB, 392]
    x1 = x_ref[:, 1, :].astype(jnp.bfloat16)

    wqkv = wqkv_ref[...]
    bqkv = bqkv_ref[...]

    # Batched QKV projection: two MXU matmuls (bf16 in, f32 accumulation).
    qkv0 = jnp.dot(x0, wqkv, preferred_element_type=jnp.float32) + bqkv
    qkv1 = jnp.dot(x1, wqkv, preferred_element_type=jnp.float32) + bqkv

    q0 = qkv0[:, :D_HEAD]
    k0 = qkv0[:, D_HEAD:2 * D_HEAD]
    v0 = qkv0[:, 2 * D_HEAD:]
    q1 = qkv1[:, :D_HEAD]
    k1 = qkv1[:, D_HEAD:2 * D_HEAD]
    v1 = qkv1[:, 2 * D_HEAD:]

    # 2x2 attention scores on the VPU/XLU (keeps the MXU for the projections).
    s00 = jnp.sum(q0 * k0, axis=-1, keepdims=True)    # [TB, 1]
    s01 = jnp.sum(q0 * k1, axis=-1, keepdims=True)
    s10 = jnp.sum(q1 * k0, axis=-1, keepdims=True)
    s11 = jnp.sum(q1 * k1, axis=-1, keepdims=True)

    # Exact 2-way softmax via the sigmoid identity:
    #   p_i0 = exp(s_i0)/(exp(s_i0)+exp(s_i1)) = 1/(1+exp(s_i1-s_i0))
    #   attn_i = p_i0*v0 + (1-p_i0)*v1 = v1 + p_i0*(v0-v1)
    p0 = 1.0 / (1.0 + jnp.exp(s01 - s00))
    p1 = 1.0 / (1.0 + jnp.exp(s11 - s10))
    dv = v0 - v1
    attn0 = v1 + p0 * dv                               # [TB, 128]
    attn1 = v1 + p1 * dv

    # head(flatten(attn)) == attn0 @ wh[:128] + attn1 @ wh[128:] + bh
    out_ref[...] = (jnp.dot(attn0, wh0_ref[...], preferred_element_type=jnp.float32)
                    + jnp.dot(attn1, wh1_ref[...], preferred_element_type=jnp.float32)
                    + bh_ref[...])                     # one dense per-tile store


@partial(jax.jit, static_argnames=("tb", "vmem_limit_bytes"))
def witmem_forward(x, wqkv, bqkv, wh, bh, *, tb=None, vmem_limit_bytes=None):
    """x: [B, SEQ, D_IN] f32; wqkv: [D_IN, 384]; bqkv: [384]; wh: [256, 10]; bh: [10]."""
    B, S, d_in = x.shape
    assert S == SEQ and d_in == D_IN

    if tb is None:
        # >=2 grid steps whenever B > 8 (v7x megacore); 256-row default cap
        # keeps the (tb,2,392) f32 tile (double-buffered) inside every chip's
        # default scoped VMEM (incl. v5e's 16 MiB).  On v6e/v7x pass
        # tb=1024..2048 with vmem_limit_bytes (~48-96 MiB) for large B.
        tb = min(256, _round_up(pl.cdiv(B, 2), 8))
    tb = B if tb >= B else _round_up(tb, 8)
    grid = (pl.cdiv(B, tb),)          # ragged final block; no HBM batch padding

    # Tiny weight-side prep (constant-folds under jit): bf16 QKV weight for
    # the MXU, head-weight split per sequence position, 2-D bias views.
    wqkv_bf16 = wqkv.astype(jnp.bfloat16)
    wh0 = wh[:D_HEAD]
    wh1 = wh[D_HEAD:]
    bqkv2 = bqkv.reshape(1, -1)
    bh2 = bh.reshape(1, -1)

    const0 = lambda i: (0, 0)         # weights stay resident across grid steps

    out = pl.pallas_call(
        witmem_kernel,
        out_shape=jax.ShapeDtypeStruct((B, N_OUT), jnp.float32),
        grid=grid,
        in_specs=[
            pl.BlockSpec((tb, SEQ, D_IN), lambda i: (i, 0, 0)),   # x tile (f32)
            pl.BlockSpec((D_IN, 3 * D_HEAD), const0),             # wqkv (bf16)
            pl.BlockSpec((1, 3 * D_HEAD), const0),                # bqkv
            pl.BlockSpec((D_HEAD, N_OUT), const0),                # wh rows   0:128
            pl.BlockSpec((D_HEAD, N_OUT), const0),                # wh rows 128:256
            pl.BlockSpec((1, N_OUT), const0),                     # bh
        ],
        out_specs=pl.BlockSpec((tb, N_OUT), lambda i: (i, 0)),
        compiler_params=pltpu.CompilerParams(
            dimension_semantics=("parallel",),                    # megacore on v7x
            vmem_limit_bytes=vmem_limit_bytes,
        ),
    )(x, wqkv_bf16, bqkv2, wh0, wh1, bh2)
    return out


def ref_forward(x, wqkv, bqkv, wh, bh):
    """Pure-JAX reference mirroring the PyTorch forward."""
    qkv = x @ wqkv + bqkv
    q = qkv[..., :D_HEAD]
    k = qkv[..., D_HEAD:2 * D_HEAD]
    v = qkv[..., 2 * D_HEAD:]
    s = jnp.einsum("bqd,bkd->bqk", q, k)
    p = jax.nn.softmax(s, axis=-1)
    attn = jnp.einsum("bqk,bkd->bqd", p, v)
    flat = attn.reshape(attn.shape[0], -1)
    return flat @ wh + bh


if __name__ == "__main__":
    key = jax.random.PRNGKey(0)
    kx, k1, k2, k3, k4 = jax.random.split(key, 5)

    # Deterministic parameter init (PyTorch-Linear-style uniform bounds),
    # stored as [in_features, out_features].
    b1 = 1.0 / (D_IN ** 0.5)
    wqkv = jax.random.uniform(k1, (D_IN, 3 * D_HEAD), jnp.float32, -b1, b1)
    bqkv = jax.random.uniform(k2, (3 * D_HEAD,), jnp.float32, -b1, b1)
    b2 = 1.0 / ((SEQ * D_HEAD) ** 0.5)
    wh = jax.random.uniform(k3, (SEQ * D_HEAD, N_OUT), jnp.float32, -b2, b2)
    bh = jax.random.uniform(k4, (N_OUT,), jnp.float32, -b2, b2)

    # Small demo batch (module-consistent shapes).
    B = 2
    x = jax.random.normal(kx, (B, SEQ, D_IN), jnp.float32)
    out = witmem_forward(x, wqkv, bqkv, wh, bh)
    jax.block_until_ready(out)
    expected = ref_forward(x, wqkv, bqkv, wh, bh)
    assert out.shape == (B, N_OUT)
    assert jnp.allclose(out, expected, rtol=5e-2, atol=5e-2), (
        f"mismatch: max abs diff {jnp.max(jnp.abs(out - expected))}")

    # Second check that exercises the multi-step batch grid plus a ragged
    # final block (3 tiles of 8 over B=22, no HBM batch padding).
    B2 = 22
    x2 = jax.random.normal(jax.random.PRNGKey(1), (B2, SEQ, D_IN), jnp.float32)
    out2 = witmem_forward(x2, wqkv, bqkv, wh, bh, tb=8)
    jax.block_until_ready(out2)
    expected2 = ref_forward(x2, wqkv, bqkv, wh, bh)
    assert out2.shape == (B2, N_OUT)
    assert jnp.allclose(out2, expected2, rtol=5e-2, atol=5e-2), (
        f"mismatch: max abs diff {jnp.max(jnp.abs(out2 - expected2))}")

    print("KERNEL_OK")
</pallas_src>

<mosaic_0001>
module attributes {stable_mosaic.version = 11 : i64} {
  func.func @witmem_kernel(%arg0: i32, %arg1: memref<2x2x392xf32, #tpu.memory_space<vmem>>, %arg2: memref<392x384xbf16, #tpu.memory_space<vmem>>, %arg3: memref<1x384xf32, #tpu.memory_space<vmem>>, %arg4: memref<128x10xf32, #tpu.memory_space<vmem>>, %arg5: memref<128x10xf32, #tpu.memory_space<vmem>>, %arg6: memref<1x10xf32, #tpu.memory_space<vmem>>, %arg7: memref<2x10xf32, #tpu.memory_space<vmem>>) attributes {dimension_semantics = [#tpu.dimension_semantics<parallel>], iteration_bounds = array<i64: 1>, scalar_prefetch = 0 : i64, scratch_operands = 0 : i64, tpu.core_type = #tpu.core_type<tc>, window_params = [{transform_indices = @transform_0, window_bounds = array<i64: 2, 2, 392>}, {pipeline_mode = #tpu.pipeline_mode<synchronous>, transform_indices = @transform_1, window_bounds = array<i64: 392, 384>}, {pipeline_mode = #tpu.pipeline_mode<synchronous>, transform_indices = @transform_2, window_bounds = array<i64: 1, 384>}, {pipeline_mode = #tpu.pipeline_mode<synchronous>, transform_indices = @transform_3, window_bounds = array<i64: 128, 10>}, {pipeline_mode = #tpu.pipeline_mode<synchronous>, transform_indices = @transform_4, window_bounds = array<i64: 128, 10>}, {pipeline_mode = #tpu.pipeline_mode<synchronous>, transform_indices = @transform_5, window_bounds = array<i64: 1, 10>}, {transform_indices = @transform_6, window_bounds = array<i64: 2, 10>}]} {
    %c0 = arith.constant 0 : index
    %c0_0 = arith.constant 0 : index
    %c0_1 = arith.constant 0 : index
    %0 = vector.load %arg1[%c0, %c0_0, %c0_1] : memref<2x2x392xf32, #tpu.memory_space<vmem>>, vector<2x1x392xf32>
    %1 = vector.shape_cast %0 : vector<2x1x392xf32> to vector<2x392xf32>
    %2 = arith.truncf %1 : vector<2x392xf32> to vector<2x392xbf16>
    %c0_2 = arith.constant 0 : index
    %c1 = arith.constant 1 : index
    %c0_3 = arith.constant 0 : index
    %3 = vector.load %arg1[%c0_2, %c1, %c0_3] : memref<2x2x392xf32, #tpu.memory_space<vmem>>, vector<2x1x392xf32>
    %4 = vector.shape_cast %3 : vector<2x1x392xf32> to vector<2x392xf32>
    %5 = arith.truncf %4 : vector<2x392xf32> to vector<2x392xbf16>
    %c0_4 = arith.constant 0 : index
    %c0_5 = arith.constant 0 : index
    %6 = vector.load %arg2[%c0_4, %c0_5] : memref<392x384xbf16, #tpu.memory_space<vmem>>, vector<392x384xbf16>
    %c0_6 = arith.constant 0 : index
    %c0_7 = arith.constant 0 : index
    %7 = vector.load %arg3[%c0_6, %c0_7] : memref<1x384xf32, #tpu.memory_space<vmem>>, vector<1x384xf32>
    %cst = arith.constant dense<0.000000e+00> : vector<2x384xf32>
    %8 = tpu.matmul %2, %6, %cst {dimension_numbers = #tpu.dot_dimension_numbers<[1], [0], [0], [1], [0, 0, 1, 1], [], []>} : vector<2x392xbf16>, vector<392x384xbf16>, vector<2x384xf32> -> vector<2x384xf32>
    %9 = vector.broadcast %7 : vector<1x384xf32> to vector<2x384xf32>
    %10 = arith.addf %8, %9 : vector<2x384xf32>
    %cst_8 = arith.constant dense<0.000000e+00> : vector<2x384xf32>
    %11 = tpu.matmul %5, %6, %cst_8 {dimension_numbers = #tpu.dot_dimension_numbers<[1], [0], [0], [1], [0, 0, 1, 1], [], []>} : vector<2x392xbf16>, vector<392x384xbf16>, vector<2x384xf32> -> vector<2x384xf32>
    %12 = vector.broadcast %7 : vector<1x384xf32> to vector<2x384xf32>
    %13 = arith.addf %11, %12 : vector<2x384xf32>
    %14 = vector.extract_strided_slice %10 {offsets = [0, 0], sizes = [2, 128], strides = [1, 1]} : vector<2x384xf32> to vector<2x128xf32>
    %15 = vector.extract_strided_slice %10 {offsets = [0, 128], sizes = [2, 128], strides = [1, 1]} : vector<2x384xf32> to vector<2x128xf32>
    %16 = vector.extract_strided_slice %10 {offsets = [0, 256], sizes = [2, 128], strides = [1, 1]} : vector<2x384xf32> to vector<2x128xf32>
    %17 = vector.extract_strided_slice %13 {offsets = [0, 0], sizes = [2, 128], strides = [1, 1]} : vector<2x384xf32> to vector<2x128xf32>
    %18 = vector.extract_strided_slice %13 {offsets = [0, 128], sizes = [2, 128], strides = [1, 1]} : vector<2x384xf32> to vector<2x128xf32>
    %19 = vector.extract_strided_slice %13 {offsets = [0, 256], sizes = [2, 128], strides = [1, 1]} : vector<2x384xf32> to vector<2x128xf32>
    %20 = arith.mulf %14, %15 : vector<2x128xf32>
    %cst_9 = arith.constant dense<0.000000e+00> : vector<2xf32>
    %21 = vector.multi_reduction <add>, %20, %cst_9 [1] : vector<2x128xf32> to vector<2xf32>
    %22 = vector.shape_cast %21 : vector<2xf32> to vector<2x1xf32>
    %23 = arith.mulf %14, %18 : vector<2x128xf32>
    %cst_10 = arith.constant dense<0.000000e+00> : vector<2xf32>
    %24 = vector.multi_reduction <add>, %23, %cst_10 [1] : vector<2x128xf32> to vector<2xf32>
    %25 = vector.shape_cast %24 : vector<2xf32> to vector<2x1xf32>
    %26 = arith.mulf %17, %15 : vector<2x128xf32>
    %cst_11 = arith.constant dense<0.000000e+00> : vector<2xf32>
    %27 = vector.multi_reduction <add>, %26, %cst_11 [1] : vector<2x128xf32> to vector<2xf32>
    %28 = vector.shape_cast %27 : vector<2xf32> to vector<2x1xf32>
    %29 = arith.mulf %17, %18 : vector<2x128xf32>
    %cst_12 = arith.constant dense<0.000000e+00> : vector<2xf32>
    %30 = vector.multi_reduction <add>, %29, %cst_12 [1] : vector<2x128xf32> to vector<2xf32>
    %31 = vector.shape_cast %30 : vector<2xf32> to vector<2x1xf32>
    %32 = arith.subf %25, %22 : vector<2x1xf32>
    %33 = math.exp %32 : vector<2x1xf32>
    %cst_13 = arith.constant 1.000000e+00 : f32
    %34 = vector.broadcast %cst_13 : f32 to vector<2x1xf32>
    %35 = arith.addf %34, %33 : vector<2x1xf32>
    %cst_14 = arith.constant 1.000000e+00 : f32
    %36 = vector.broadcast %cst_14 : f32 to vector<2x1xf32>
    %37 = arith.divf %36, %35 : vector<2x1xf32>
    %38 = arith.subf %31, %28 : vector<2x1xf32>
    %39 = math.exp %38 : vector<2x1xf32>
    %cst_15 = arith.constant 1.000000e+00 : f32
    %40 = vector.broadcast %cst_15 : f32 to vector<2x1xf32>
    %41 = arith.addf %40, %39 : vector<2x1xf32>
    %cst_16 = arith.constant 1.000000e+00 : f32
    %42 = vector.broadcast %cst_16 : f32 to vector<2x1xf32>
    %43 = arith.divf %42, %41 : vector<2x1xf32>
    %44 = arith.subf %16, %19 : vector<2x128xf32>
    %45 = vector.broadcast %37 : vector<2x1xf32> to vector<2x128xf32>
    %46 = arith.mulf %45, %44 : vector<2x128xf32>
    %47 = arith.addf %19, %46 : vector<2x128xf32>
    %48 = vector.broadcast %43 : vector<2x1xf32> to vector<2x128xf32>
    %49 = arith.mulf %48, %44 : vector<2x128xf32>
    %50 = arith.addf %19, %49 : vector<2x128xf32>
    %c0_17 = arith.constant 0 : index
    %c0_18 = arith.constant 0 : index
    %51 = vector.load %arg4[%c0_17, %c0_18] : memref<128x10xf32, #tpu.memory_space<vmem>>, vector<128x10xf32>
    %cst_19 = arith.constant dense<0.000000e+00> : vector<2x10xf32>
    %52 = tpu.matmul %47, %51, %cst_19 {dimension_numbers = #tpu.dot_dimension_numbers<[1], [0], [0], [1], [0, 0, 1, 1], [], []>} : vector<2x128xf32>, vector<128x10xf32>, vector<2x10xf32> -> vector<2x10xf32>
    %c0_20 = arith.constant 0 : index
    %c0_21 = arith.constant 0 : index
    %53 = vector.load %arg5[%c0_20, %c0_21] : memref<128x10xf32, #tpu.memory_space<vmem>>, vector<128x10xf32>
    %cst_22 = arith.constant dense<0.000000e+00> : vector<2x10xf32>
    %54 = tpu.matmul %50, %53, %cst_22 {dimension_numbers = #tpu.dot_dimension_numbers<[1], [0], [0], [1], [0, 0, 1, 1], [], []>} : vector<2x128xf32>, vector<128x10xf32>, vector<2x10xf32> -> vector<2x10xf32>
    %55 = arith.addf %52, %54 : vector<2x10xf32>
    %c0_23 = arith.constant 0 : index
    %c0_24 = arith.constant 0 : index
    %56 = vector.load %arg6[%c0_23, %c0_24] : memref<1x10xf32, #tpu.memory_space<vmem>>, vector<1x10xf32>
    %57 = vector.broadcast %56 : vector<1x10xf32> to vector<2x10xf32>
    %58 = arith.addf %55, %57 : vector<2x10xf32>
    %c0_25 = arith.constant 0 : index
    %c0_26 = arith.constant 0 : index
    %59 = vector.load %arg7[%c0_25, %c0_26] : memref<2x10xf32, #tpu.memory_space<vmem>>, vector<2x10xf32>
    tpu.vector_store %arg7[%c0_25, %c0_26], %58 {strides = array<i32>} : memref<2x10xf32, #tpu.memory_space<vmem>>, vector<2x10xf32>,
    return
  }
  func.func @transform_0(%arg0: i32) -> (i32, i32, i32) {
    %c0_i32 = arith.constant 0 : i32
    %c0_i32_0 = arith.constant 0 : i32
    %c0_i32_1 = arith.constant 0 : i32
    return %arg0, %c0_i32, %c0_i32_0 : i32, i32, i32
  }
  func.func @transform_1(%arg0: i32) -> (i32, i32) {
    %c0_i32 = arith.constant 0 : i32
    %c0_i32_0 = arith.constant 0 : i32
    %c0_i32_1 = arith.constant 0 : i32
    return %c0_i32, %c0_i32_0 : i32, i32
  }
  func.func @transform_2(%arg0: i32) -> (i32, i32) {
    %c0_i32 = arith.constant 0 : i32
    %c0_i32_0 = arith.constant 0 : i32
    %c0_i32_1 = arith.constant 0 : i32
    return %c0_i32, %c0_i32_0 : i32, i32
  }
  func.func @transform_3(%arg0: i32) -> (i32, i32) {
    %c0_i32 = arith.constant 0 : i32
    %c0_i32_0 = arith.constant 0 : i32
    %c0_i32_1 = arith.constant 0 : i32
    return %c0_i32, %c0_i32_0 : i32, i32
  }
  func.func @transform_4(%arg0: i32) -> (i32, i32) {
    %c0_i32 = arith.constant 0 : i32
    %c0_i32_0 = arith.constant 0 : i32
    %c0_i32_1 = arith.constant 0 : i32
    return %c0_i32, %c0_i32_0 : i32, i32
  }
  func.func @transform_5(%arg0: i32) -> (i32, i32) {
    %c0_i32 = arith.constant 0 : i32
    %c0_i32_0 = arith.constant 0 : i32
    %c0_i32_1 = arith.constant 0 : i32
    return %c0_i32, %c0_i32_0 : i32, i32
  }
  func.func @transform_6(%arg0: i32) -> (i32, i32) {
    %c0_i32 = arith.constant 0 : i32
    %c0_i32_0 = arith.constant 0 : i32
    return %arg0, %c0_i32 : i32, i32
  }
}

</mosaic_0001>

<bundles_post_ra>
// kernel: witmem_forward.1
= control target key start
LH: loop header
LB: loop body
LE: loop exit
PB: predicated region body
PF: predicated region fallthrough
CT: control target
= control target key end

     0   :  { %v30_v17 = vlaneseq  ;;  %vm675_vm0 = vcmask 1043456   ;;  %vm264_vm1 = vcmask 1041409   ;;  %vm671_vm2 = vcmask 64512   ;;  %s2478_s0 = inlined_call_operand.vmem [shape: f32[2,2,392], index: 0, kind: input, shape index: {}]   ;;  %s2479_s1 = inlined_call_operand.vmem [shape: bf16[392,384], index: 1, kind: input, shape index: {}]   ;;  %s2480_s2 = inlined_call_operand.vmem [shape: f32[1,384], index: 2, kind: input, shape index: {}]   ;;  %s2481_s3 = inlined_call_operand.vmem [shape: f32[128,10], index: 3, kind: input, shape index: {}]   ;;  %s2482_s4 = inlined_call_operand.vmem [shape: f32[128,10], index: 4, kind: input, shape index: {}]   ;;  %s2483_s5 = inlined_call_operand.vmem [shape: f32[1,10], index: 5, kind: input, shape index: {}]   ;;  %s2484_s6 = inlined_call_operand.hbm [shape: f32[2,10], index: 6, kind: output, shape index: {}]  }
   0x1   :  { %v1681_v0 = vld [vmem:[%s2479_s1 + $0xac] ss:$12 sps:$4 sm:$0xff]   ;;  %v1692_v2 = vld [vmem:[%s2479_s1 + $0xa8] ss:$12 sps:$4 sm:$0xff]   ;;  %v1715_v6 = vld [vmem:[%s2479_s1 + $0x90] ss:$12 sps:$4 sm:$0xff]  }
   0x2   :  { %v1686_v1 = vld [vmem:[%s2479_s1 + $0x22c] ss:$12 sps:$4 sm:$0xff]   ;;  %685 = vmatprep.subr.bf16.mxu0 %v1681_v0  ;;  %v1697_v3 = vld [vmem:[%s2479_s1 + $0x228] ss:$12 sps:$4 sm:$0xff]   ;;  %v1721_v7 = vld [vmem:[%s2479_s1 + $0x210] ss:$12 sps:$4 sm:$0xff]  }
   0x3   :  { %726 = vmatprep.subr.bf16.mxu1 %v1686_v1  ;;  %v1703_v4 = vld [vmem:[%s2479_s1 + $0x94] ss:$12 sps:$4 sm:$0xff]   ;;  %686 = vmatpush1.bf16.msra.mxu0 %v1692_v2  ;;  %v1727_v8 = vld [vmem:[%s2479_s1 + $0x7c] ss:$12 sps:$4 sm:$0xff]   ;;  %v1737_v10 = vld [vmem:[%s2479_s1 + $0x78] ss:$12 sps:$4 sm:$0xff]  }
   0x4   :  { %727 = vmatpush1.bf16.msra.mxu1 %v1697_v3  ;;  %v1710_v5 = vld [vmem:[%s2479_s1 + $0x214] ss:$12 sps:$4 sm:$0xff]   ;;  %687 = vmatprep.subr.bf16.mxu0 %v1703_v4  ;;  %v1732_v9 = vld [vmem:[%s2479_s1 + $0x1fc] ss:$12 sps:$4 sm:$0xff]   ;;  %v1742_v11 = vld [vmem:[%s2479_s1 + $0x1f8] ss:$12 sps:$4 sm:$0xff]  }
   0x5   :  { %728 = vmatprep.subr.bf16.mxu1 %v1710_v5  ;;  %v1749_v12 = vld [vmem:[%s2479_s1 + $0x64] ss:$12 sps:$4 sm:$0xff]   ;;  %v1761_v14 = vld [vmem:[%s2479_s1 + $0x60] ss:$12 sps:$4 sm:$0xff]   ;;  %v1785_v19 = vld [vmem:[%s2479_s1 + $0x48] ss:$12 sps:$4 sm:$0xff]  }
   0x6   :  { %v1756_v13 = vld [vmem:[%s2479_s1 + $0x1e4] ss:$12 sps:$4 sm:$0xff]   ;;  %v1768_v15 = vld [vmem:[%s2479_s1 + $0x1e0] ss:$12 sps:$4 sm:$0xff]   ;;  %v1790_v20 = vld [vmem:[%s2479_s1 + $0x1c8] ss:$12 sps:$4 sm:$0xff]  }
   0x7   :  { %688 = vmatpush1.bf16.msra.mxu0 %v1715_v6  ;;  %v1773_v16 = vld [vmem:[%s2479_s1 + $0x4c] ss:$12 sps:$4 sm:$0xff]   ;;  %v1797_v21 = vld [vmem:[%s2479_s1 + $0x34] ss:$12 sps:$4 sm:$0xff]   ;;  %v1799_v22 = vshrl.u32 %v30_v17, 7 }
   0x8   :  { %729 = vmatpush1.bf16.msra.mxu1 %v1721_v7  ;;  %689 = vmatprep.subr.bf16.mxu0 %v1727_v8  ;;  %v1780_v18 = vld [vmem:[%s2479_s1 + $0x1cc] ss:$12 sps:$4 sm:$0xff]   ;;  %v1806_v23 = vld [vmem:[%s2479_s1 + $0x1b4] ss:$12 sps:$4 sm:$0xff]   ;;  %v1811_v24 = vld [vmem:[%s2479_s1 + $0x30] ss:$12 sps:$4 sm:$0xff]  }
   0x9   :  { %730 = vmatprep.subr.bf16.mxu1 %v1732_v9  ;;  %v1818_v25 = vld [vmem:[%s2479_s1 + $0x1b0] ss:$12 sps:$4 sm:$0xff]   ;;  %v1826_v27 = vsub.s32 3, %v1799_v22  ;;  %v1836_v29 = vsub.s32 2, %v1799_v22  ;;  %v1839_v30 = vsub.s32 1, %v1799_v22  ;;  %v228_v37 = vld [vmem:[%s2479_s1 + $0x240] sm:$0xff] }
   0xa   :  { %2512 = vst [vmem:[#allocation5_spill] sm:$0xff] %v1818_v25  ;;  %v1823_v26 = vld [vmem:[%s2479_s1 + $0x1c] ss:$12 sps:$4 sm:$0xff]   ;;  %v1844_v31 = vld [vmem:[%s2479_s1 + $0x18] ss:$12 sps:$4 sm:$0xff]   ;;  %v1348_v51 = vcombine.low %v228_v37, %v228_v37  ;;  %v1909_v56 = vcombine.high %v228_v37, %v228_v37 }
   0xb   :  { %690 = vmatpush1.bf16.msra.mxu0 %v1737_v10  ;;  %v1833_v28 = vld [vmem:[%s2479_s1 + $0x19c] ss:$12 sps:$4 sm:$0xff]   ;;  %2514 = vst [vmem:[#allocation7_spill] sm:$0xff] %v1836_v29  ;;  %2515 = vst [vmem:[#allocation8_spill] sm:$0xff] %v1839_v30  ;;  %v1849_v32 = vld [vmem:[%s2479_s1 + $0x198] ss:$12 sps:$4 sm:$0xff]  }
   0xc   :  { %731 = vmatpush1.bf16.msra.mxu1 %v1742_v11  ;;  %691 = vmatprep.subr.bf16.mxu0 %v1749_v12  ;;  %2513 = vst [vmem:[#allocation6_spill] sm:$0xff] %v1833_v28  ;;  %2516 = vst [vmem:[#allocation9_spill] sm:$0xff] %v1849_v32  ;;  %v1854_v33 = vld [vmem:[%s2479_s1 + $0x4] ss:$12 sps:$4 sm:$0xff]   ;;  %v1893_v47 = vld [vmem:[%s2479_s1] ss:$12 sps:$4 sm:$0xff]  }
   0xd   :  { %732 = vmatprep.subr.bf16.mxu1 %v1756_v13  ;;  %v1859_v34 = vld [vmem:[%s2479_s1 + $0x184] ss:$12 sps:$4 sm:$0xff]   ;;  %v1869_v36 = vld [vmem:[%s2478_s0 + $0x8] ss:$2 sm:$0xf]  ;;  %2519 = vst [vmem:[#allocation12_spill] sm:$0xff] %v1909_v56 }
   0xe   :  { %2517 = vst [vmem:[#allocation10_spill] sm:$0xff] %v1859_v34  ;;  %v1864_v35 = vld [vmem:[%s2478_s0] ss:$2 sm:$0xf]  ;;  %v61_v39 = vrot.slane %v1869_v36, %v1826_v27  ;;  %v57_v41 = vrot.slane %v1869_v36, %v1836_v29  ;;  %v53_v43 = vrot.slane %v1869_v36, %v1839_v30  ;;  %v1907_v55 = vld [vmem:[%s2479_s1 + $0x16c] ss:$12 sps:$4 sm:$0xff]  }
   0xf   :  { %692 = vmatpush1.bf16.msra.mxu0 %v1761_v14  ;;  %v45_v38 = vrot.slane %v1864_v35, %v1826_v27  ;;  %v41_v40 = vrot.slane %v1864_v35, %v1836_v29  ;;  %v37_v42 = vrot.slane %v1864_v35, %v1839_v30  ;;  %v1900_v50 = vld [vmem:[%s2479_s1 + $0x180] ss:$12 sps:$4 sm:$0xff]   ;;  %v1914_v61 = vld [vmem:[%s2479_s1 + $0x168] ss:$12 sps:$4 sm:$0xff]   ;;  %v1919_v63 = vsel %vm675_vm0, %v1348_v51, 0 }
  0x10   :  { %733 = vmatpush1.bf16.msra.mxu1 %v1768_v15  ;;  %693 = vmatprep.subr.bf16.mxu0 %v1773_v16  ;;  %v77_v45 = vpack.c.bf16 %v61_v39, %v61_v39  ;;  %v76_v48 = vpack.c.bf16 %v57_v41, %v57_v41  ;;  %v75_v49 = vpack.c.bf16 %v53_v43, %v53_v43  ;;  %v1925_v37 = vld [vmem:[%s2479_s1 + $0x154] ss:$12 sps:$4 sm:$0xff]   ;;  %v1936_v41 = vld [vmem:[%s2479_s1 + $0x170] ss:$12 sps:$4 sm:$0xff]  }
  0x11   :  { %734 = vmatprep.subr.bf16.mxu1 %v1780_v18  ;;  %v73_v44 = vpack.c.bf16 %v45_v38, %v45_v38  ;;  %v72_v46 = vpack.c.bf16 %v41_v40, %v41_v40  ;;  %2518 = vst [vmem:[#allocation11_spill] sm:$0xff] %v1900_v50  ;;  %v71_v54 = vpack.c.bf16 %v37_v42, %v37_v42  ;;  %2520 = vst [vmem:[#allocation13_spill] sm:$0xff] %v1919_v63  ;;  %v1941_v42 = vld [vmem:[%s2479_s1 + $0x150] ss:$12 sps:$4 sm:$0xff]  }
  0x12   :  { %v262_v53 = vunpack.c.l.b16 %v77_v45  ;;  %v261_v58 = vunpack.c.l.b16 %v76_v48  ;;  %v260_v60 = vunpack.c.l.b16 %v75_v49  ;;  %2521 = vst [vmem:[#allocation14_spill] sm:$0xff] %v1936_v41  ;;  %v1950_v45 = vld [vmem:[%s2479_s1 + $0xb0] ss:$12 sps:$4 sm:$0xff]   ;;  %v1965_v49 = vld [vmem:[%s2479_s1 + $0x158] ss:$12 sps:$4 sm:$0xff]  }
  0x13   :  { %694 = vmatpush1.bf16.msra.mxu0 %v1785_v19  ;;  %v258_v52 = vunpack.c.l.b16 %v73_v44  ;;  %v257_v57 = vunpack.c.l.b16 %v72_v46  ;;  %v256_v38 = vunpack.c.l.b16 %v71_v54  ;;  %2522 = vst [vmem:[#allocation15_spill] sm:$0xff] %v1950_v45  ;;  %v1957_v46 = vld [vmem:[%s2479_s1 + $0x13c] ss:$12 sps:$4 sm:$0xff]   ;;  %2523 = vst [vmem:[#allocation16_spill] sm:$0xff] %v1965_v49  ;;  %v1979_v54 = vld [vmem:[%s2479_s1 + $0x98] ss:$12 sps:$4 sm:$0xff]  }
  0x14   :  { %735 = vmatpush1.bf16.msra.mxu1 %v1790_v20  ;;  %695 = vmatprep.subr.bf16.mxu0 %v1797_v21  ;;  %v270_v59 = vrot.slane %v262_v53, 7  ;;  %v268_v62 = vrot.slane %v261_v58, 7  ;;  %v266_v43 = vrot.slane %v260_v60, 7  ;;  %v1974_v53 = vld [vmem:[%s2479_s1 + $0x138] ss:$12 sps:$4 sm:$0xff]   ;;  %2524 = vst [vmem:[#allocation17_spill] sm:$0xff] %v1979_v54 }
  0x15   :  { %736 = vmatprep.subr.bf16.mxu1 %v1806_v23  ;;  %v1998_v58 = vld [vmem:[%s2479_s1 + $0x120] ss:$12 sps:$4 sm:$0xff]  }
  0x16   :  { %v271_v17 = vsel %vm264_vm1, %v270_v59, %v258_v52  ;;  %v269_v40 = vsel %vm264_vm1, %v268_v62, %v257_v57  ;;  %v267_v48 = vsel %vm264_vm1, %v266_v43, %v256_v38  ;;  %v1968_v52 = vsub.s32 0, %v1799_v22  ;;  %v1986_v22 = vld [vmem:[%s2479_s1 + $0x124] ss:$12 sps:$4 sm:$0xff]   ;;  %v1993_v57 = vld [vmem:[%s2479_s1 + $0x140] ss:$12 sps:$4 sm:$0xff]  }
  0x17   :  { %696 = vmatpush1.bf16.msra.mxu0 %v1811_v24  ;;  %v1930_v39 = vpack.c.b16 %v271_v17, %v271_v17  ;;  %v1945_v44 = vpack.c.b16 %v269_v40, %v269_v40  ;;  %v273_v51 = vpack.c.b16 %v267_v48, %v267_v48  ;;  %2525 = vst [vmem:[#allocation18_spill] sm:$0xff] %v1993_v57  ;;  %v2005_v60 = vld [vmem:[%s2479_s1 + $0x80] ss:$12 sps:$4 sm:$0xff]   ;;  %v2024_v17 = vld [vmem:[%s2479_s1 + $0x108] ss:$12 sps:$4 sm:$0xff]  }
  0x18   :  { %737 = vmatpush1.bf16.msra.mxu1 %v1818_v25  ;;  %697 = vmatprep.subr.bf16.mxu0 %v1823_v26  ;;  %v49_v59 = vrot.slane %v1869_v36, %v1968_v52  ;;  %2526 = vst [vmem:[#allocation19_spill] sm:$0xff] %v2005_v60  ;;  %v2012_v62 = vld [vmem:[%s2479_s1 + $0x10c] ss:$12 sps:$4 sm:$0xff]   ;;  %v2019_v36 = vld [vmem:[%s2479_s1 + $0x128] ss:$12 sps:$4 sm:$0xff]   ;;  %v33_v48 = vrot.slane %v1864_v35, %v1968_v52 }
  0x19   :  { %738 = vmatprep.subr.bf16.mxu1 %v1833_v28  ;;  %1352 = vmatprep.mubr.msk.bf16.mxu1 %vm671_vm2, %v1930_v39  ;;  %2527 = vst [vmem:[#allocation20_spill] sm:$0xff] %v2019_v36  ;;  %v2029_v40 = vld [vmem:[%s2479_s1 + $0x68] ss:$12 sps:$4 sm:$0xff]  }
  0x1a   :  { %717 = vmatprep.mubr.bf16.mxu0 %v273_v51  ;;  %v74_v38 = vpack.c.bf16 %v49_v59, %v49_v59  ;;  %2528 = vst [vmem:[#allocation21_spill] sm:$0xff] %v2029_v40  ;;  %v2036_v43 = vld [vmem:[%s2479_s1 + $0xf4] ss:$12 sps:$4 sm:$0xff]   ;;  %v2050_v59 = vld [vmem:[%s2479_s1 + $0xf0] ss:$12 sps:$4 sm:$0xff]  }
  0x1b   :  { %698 = vmatpush1.bf16.msra.mxu0 %v1844_v31  ;;  %v2062_v35 = vld [vmem:[%s2479_s1 + $0xdc] ss:$12 sps:$4 sm:$0xff]  }
  0x1c   :  { %739 = vmatpush1.bf16.msra.mxu1 %v1849_v32  ;;  %699 = vmatprep.subr.bf16.mxu0 %v1854_v33  ;;  %2531 = vst [vmem:[#allocation24_spill] sm:$0xff] %v2062_v35 }
  0x1d   :  { %740 = vmatprep.subr.bf16.mxu1 %v1859_v34 }
  0x1f   :  { %700 = vmatpush1.bf16.msra.mxu0 %v1893_v47 }
  0x20   :  { %741 = vmatpush1.bf16.msra.mxu1 %v1900_v50  ;;  %701 = vmatprep.subr.bf16.mxu0 %v1907_v55 }
  0x21   :  { %1351 = vmatprep.subr.msk.bf16.mxu1 %vm675_vm0, %v1909_v56 }
  0x23   :  { %702 = vmatpush2.bf16.msra.mxu0 %v1914_v61 }
  0x24   :  { %757 = vmatpush2.bf16.msra.mxu1 %v1919_v63  ;;  %703 = vmatprep.subr.bf16.mxu0 %v1925_v37 }
  0x25   :  { %1358 = vmatprep.subr.bf16.mxu1 %v1936_v41 }
  0x27   :  { %759 = vmatmul.mubr.bf16.vlgmr.msra.gmra.mxu1 %v1945_v44  ;;  %704 = vmatpush2.bf16.msra.mxu0 %v1941_v42 }
  0x28   :  { %1359 = vmatpush3.bf16.msra.mxu1 %v1950_v45  ;;  %705 = vmatprep.subr.bf16.mxu0 %v1957_v46 }
  0x29   :  { %1360 = vmatprep.subr.bf16.mxu1 %v1965_v49  ;;  %799 = vmatprep.mubr.bf16.mxu1 %v273_v51  ;;  %v2045_v51 = vld [vmem:[%s2479_s1 + $0x110] ss:$12 sps:$4 sm:$0xff]   ;;  %v2093_v49 = vld [vmem:[%s2479_s1 + $0xe0] ss:$12 sps:$4 sm:$0xff]  }
  0x2a   :  { %2529 = vst [vmem:[#allocation22_spill] sm:$0xff] %v2045_v51  ;;  %2536 = vst [vmem:[#allocation29_spill] sm:$0xff] %v2093_v49 }
  0x2b   :  { %706 = vmatpush2.bf16.msra.mxu0 %v1974_v53 }
  0x2c   :  { %1361 = vmatpush3.bf16.msra.mxu1 %v1979_v54  ;;  %707 = vmatprep.subr.bf16.mxu0 %v1986_v22 }
  0x2d   :  { %1362 = vmatprep.subr.bf16.mxu1 %v1993_v57  ;;  %v2055_v57 = vld [vmem:[%s2479_s1 + $0x50] ss:$12 sps:$4 sm:$0xff]  }
  0x2e   :  { %2530 = vst [vmem:[#allocation23_spill] sm:$0xff] %v2055_v57 }
  0x2f   :  { %708 = vmatpush2.bf16.msra.mxu0 %v1998_v58 }
  0x30   :  { %1363 = vmatpush3.bf16.msra.mxu1 %v2005_v60  ;;  %709 = vmatprep.subr.bf16.mxu0 %v2012_v62  ;;  %v259_v60 = vunpack.c.l.b16 %v74_v38  ;;  %v2069_v38 = vld [vmem:[%s2479_s1 + $0xf8] ss:$12 sps:$4 sm:$0xff]  }
  0x31   :  { %1364 = vmatprep.subr.bf16.mxu1 %v2019_v36  ;;  %v70_v36 = vpack.c.bf16 %v33_v48, %v33_v48  ;;  %2532 = vst [vmem:[#allocation25_spill] sm:$0xff] %v2069_v38  ;;  %v2081_v48 = vld [vmem:[%s2479_s1 + $0x38] ss:$12 sps:$4 sm:$0xff]  }
  0x32   :  { %v263_v54 = vrot.slane %v259_v60, 7  ;;  %2534 = vst [vmem:[#allocation27_spill] sm:$0xff] %v2081_v48  ;;  %v2088_v60 = vld [vmem:[%s2479_s1 + $0xc4] ss:$12 sps:$4 sm:$0xff]  }
  0x33   :  { %710 = vmatpush2.bf16.msra.mxu0 %v2024_v17  ;;  %2535 = vst [vmem:[#allocation28_spill] sm:$0xff] %v2088_v60 }
  0x34   :  { %1365 = vmatpush3.bf16.msra.mxu1 %v2029_v40  ;;  %711 = vmatprep.subr.bf16.mxu0 %v2036_v43  ;;  %v2074_v40 = vld [vmem:[%s2479_s1 + $0xd8] ss:$12 sps:$4 sm:$0xff]  }
  0x35   :  { %1366 = vmatprep.subr.bf16.mxu1 %v2045_v51  ;;  %2533 = vst [vmem:[#allocation26_spill] sm:$0xff] %v2074_v40  ;;  %v255_v51 = vunpack.c.l.b16 %v70_v36  ;;  %v2103_v36 = vld [vmem:[%s2478_s0 + $0x9] ss:$2 sm:$0xf] }
  0x36   :  { %v107_v45 = vrot.slane %v2103_v36, %v1839_v30 }
  0x37   :  { %712 = vmatpush2.bf16.msra.mxu0 %v2050_v59 }
  0x38   :  { %1367 = vmatpush3.bf16.msra.mxu1 %v2055_v57  ;;  %713 = vmatprep.subr.bf16.mxu0 %v2062_v35  ;;  %v2098_v57 = vld [vmem:[%s2478_s0 + $0x1] ss:$2 sm:$0xf] }
  0x39   :  { %1368 = vmatprep.subr.bf16.mxu1 %v2069_v38  ;;  %v91_v38 = vrot.slane %v2098_v57, %v1839_v30 }
  0x3a   :  { %11 = vsyncpa [#allocation3], 0  ;;  %v2114_v63 = vld [vmem:[%s2479_s1 + $0xc0] ss:$12 sps:$4 sm:$0xff]   ;;  %v265_v56 = vsel %vm264_vm1, %v263_v54, %v255_v51  ;;  %v99_v30 = vrot.slane %v2098_v57, %v1826_v27  ;;  %v115_v50 = vrot.slane %v2103_v36, %v1826_v27  ;;  %v129_v32 = vpack.c.bf16 %v107_v45, %v107_v45  ;;  %s1642_s17 = smov [#allocation2]  }
  0x3b   :  { %714 = vmatpush2.bf16.msra.mxu0 %v2074_v40  ;;  %2537 = vst [vmem:[#allocation30_spill] sm:$0xff] %v2114_v63  ;;  %v2119_v41 = vld [vmem:[%s2479_s1 + $0x20] ss:$12 sps:$4 sm:$0xff]   ;;  %v125_v34 = vpack.c.bf16 %v91_v38, %v91_v38  ;;  %v95_v54 = vrot.slane %v2098_v57, %v1836_v29  ;;  %v272_v51 = vpack.c.b16 %v265_v56, %v265_v56  ;;  %v2142_v38 = vld [vmem:[%s2479_s1 + $0x8] ss:$12 sps:$4 sm:$0xff]   ;;  %v1639_v56 = vmov 0  }
  0x3c   :  { %1369 = vmatpush3.bf16.msra.mxu1 %v2081_v48  ;;  %2538 = vst [vmem:[#allocation31_spill] sm:$0xff] %v2119_v41  ;;  %715 = vmatprep.subr.bf16.mxu0 %v2088_v60  ;;  %v2131_v48 = vld [vmem:[%s2479_s1 + $0xc8] ss:$12 sps:$4 sm:$0xff]   ;;  %v127_v40 = vpack.c.bf16 %v99_v30, %v99_v30  ;;  %v131_v28 = vpack.c.bf16 %v115_v50, %v115_v50  ;;  %v860_v25 = vunpack.c.l.b16 %v129_v32  ;;  %v2147_v30 = vld [vmem:[%s2479_s1 + $0x230] ss:$12 sps:$4 sm:$0xff]   ;;  %vm1044_vm3 = vcmask 1041408  }
  0x3d   :  { %1370 = vmatprep.subr.bf16.mxu1 %v2093_v49  ;;  %v856_v35 = vunpack.c.l.b16 %v125_v34  ;;  %v111_v27 = vrot.slane %v2103_v36, %v1836_v29  ;;  %v126_v32 = vpack.c.bf16 %v95_v54, %v95_v54  ;;  %vm1641_vm4 = vmmov 0   ;;  %s1265_s18 = sshll.u32 %s1642_s17, 4  ;;  %s1266_s18 = int_to_ptr.vmem [resolvable:$true] %s1265_s18 }
  0x3e   :  { %v858_v50 = vunpack.c.l.b16 %v127_v40  ;;  %v862_v34 = vunpack.c.l.b16 %v131_v28  ;;  %v865_v45 = vrot.slane %v860_v25, 7  ;;  %v2157_v28 = vld [vmem:[%s2479_s1 + $0x218] ss:$12 sps:$4 sm:$0xff]   ;;  %vm1257_vm5 = vcmask 74752   ;;  %s1617_s19 = scalar_lea.vmem %s1266_s18, 32  ;;  %p1622_p1 = scmp.lt.s32.totalorder %s1266_s18, %s1266_s18 }
  0x3f   :  { %716 = vmatpush2.bf16.msra.mxu0 %v2114_v63  ;;  %v130_v29 = vpack.c.bf16 %v111_v27, %v111_v27  ;;  %v857_v63 = vunpack.c.l.b16 %v126_v32  ;;  %v2564_v27 = vld [vmem:[#allocation8_spill] sm:$0xff]  ;;  %p1618_p0 = scmp.ne.s32.totalorder %s1266_s18, %s1617_s19  ;;  %p1623_p2 = scmp.lt.s32.totalorder %s1617_s19, %s1617_s19 }
  0x40   :  { %1371 = vmatpush3.bf16.msra.mxu1 %v2119_v41  ;;  %807 = vmatprep.subr.bf16.mxu0 %v1639_v56  ;;  %v869_v41 = vrot.slane %v862_v34, 7  ;;  %v866_v49 = vsel %vm264_vm1, %v865_v45, %v856_v35 }
  0x41   :  { %1372 = vmatprep.subr.bf16.mxu1 %v2131_v48  ;;  %v861_v60 = vunpack.c.l.b16 %v130_v29  ;;  %v2164_v29 = vpack.c.b16 %v866_v49, %v866_v49  ;;  %v2556_v49 = vld [vmem:[#allocation20_spill] sm:$0xff]  ;;  %p1624_p3 = por %p1623_p2, %p1622_p1 }
  0x42   :  { %718 = vmatmul.mubr.bf16.vlgmr.msra.gmra.mxu0 %v272_v51  ;;  %v870_v40 = vsel %vm264_vm1, %v869_v41, %v858_v50  ;;  %v2174_v41 = vld [vmem:[%s2479_s1 + $0x200] ss:$12 sps:$4 sm:$0xff]  }
  0x43   :  { %808 = vmatpush1.bf16.msra.mxu0 %v2147_v30  ;;  %v867_v25 = vrot.slane %v861_v60, 7  ;;  %1353 = vmatprep.mubr.msk.bf16.mxu0 %vm671_vm2, %v1930_v39  ;;  %v2552_v39 = vld [vmem:[#allocation16_spill] sm:$0xff]  ;;  %p1625_p4 = pnand %p1624_p3, %p1618_p0 }
  0x44   :  { %1373 = vmatpush3.bf16.msra.mxu1 %v2142_v38  ;;  %809 = vmatprep.subr.bf16.mxu0 %v1639_v56 }
  0x45   :  { %881 = vmatprep.subr.bf16.mxu1 %v1681_v0  ;;  %v2167_v35 = vsel %vm264_vm1, %v867_v25, %v857_v63  ;;  %v2184_v0 = vld [vmem:[%s2479_s1 + $0x1e8] ss:$12 sps:$4 sm:$0xff]  }
  0x46   :  { %v2550_v63 = vld [vmem:[#allocation13_spill] sm:$0xff]  ;;  %v2565_v25 = vld [vmem:[#allocation7_spill] sm:$0xff] }
  0x47   :  { %800 = vmatmul.mubr.bf16.vlgmr.msra.gmra.mxu1 %v272_v51  ;;  %810 = vmatpush1.bf16.msra.mxu0 %v2157_v28 }
  0x48   :  { %882 = vmatpush1.bf16.msra.mxu1 %v1692_v2  ;;  %811 = vmatprep.subr.bf16.mxu0 %v1639_v56  ;;  %v2193_v2 = vld [vmem:[%s2479_s1 + $0x1d0] ss:$12 sps:$4 sm:$0xff]  }
  0x49   :  { %883 = vmatprep.subr.bf16.mxu1 %v1703_v4  ;;  %913 = vmatprep.mubr.bf16.mxu1 %v2164_v29  ;;  %v2202_v4 = vld [vmem:[%s2479_s1 + $0x1b8] ss:$12 sps:$4 sm:$0xff]  }
  0x4b   :  { %812 = vmatpush1.bf16.msra.mxu0 %v2174_v41 }
  0x4c   :  { %884 = vmatpush1.bf16.msra.mxu1 %v1715_v6  ;;  %813 = vmatprep.subr.bf16.mxu0 %v1639_v56  ;;  %v2211_v6 = vld [vmem:[%s2479_s1 + $0x1a0] ss:$12 sps:$4 sm:$0xff]  }
  0x4d   :  { %885 = vmatprep.subr.bf16.mxu1 %v1727_v8  ;;  %v2220_v8 = vld [vmem:[%s2479_s1 + $0x188] ss:$12 sps:$4 sm:$0xff]  }
  0x4f   :  { %814 = vmatpush1.bf16.msra.mxu0 %v2184_v0 }
  0x50   :  { %886 = vmatpush1.bf16.msra.mxu1 %v1737_v10  ;;  %815 = vmatprep.subr.bf16.mxu0 %v1639_v56  ;;  %v1608_v10 = vld [vmem:[%s2479_s1 + $0x248] ss:$0 sps:$4 sm:$0xff]  }
  0x51   :  { %887 = vmatprep.subr.bf16.mxu1 %v1749_v12  ;;  %v2232_v12 = vsel %vm675_vm0, %v1608_v10, 0 }
  0x53   :  { %816 = vmatpush1.bf16.msra.mxu0 %v2193_v2 }
  0x54   :  { %888 = vmatpush1.bf16.msra.mxu1 %v1761_v14  ;;  %817 = vmatprep.subr.bf16.mxu0 %v1639_v56  ;;  %v874_v14 = vpack.c.b16 %v870_v40, %v870_v40 }
  0x55   :  { %889 = vmatprep.subr.bf16.mxu1 %v1773_v16  ;;  %v2540_v16 = vld [vmem:[#allocation24_spill] sm:$0xff] }
  0x57   :  { %818 = vmatpush1.bf16.msra.mxu0 %v2202_v4 }
  0x58   :  { %890 = vmatpush1.bf16.msra.mxu1 %v1785_v19  ;;  %819 = vmatprep.subr.bf16.mxu0 %v1639_v56  ;;  %v2541_v19 = vld [vmem:[#allocation6_spill] sm:$0xff] }
  0x59   :  { %891 = vmatprep.subr.bf16.mxu1 %v1797_v21  ;;  %v2543_v21 = vld [vmem:[#allocation9_spill] sm:$0xff] }
  0x5b   :  { %820 = vmatpush1.bf16.msra.mxu0 %v2211_v6 }
  0x5c   :  { %892 = vmatpush1.bf16.msra.mxu1 %v1811_v24  ;;  %821 = vmatprep.subr.bf16.mxu0 %v1639_v56  ;;  %v2544_v24 = vld [vmem:[#allocation28_spill] sm:$0xff] }
  0x5d   :  { %893 = vmatprep.subr.bf16.mxu1 %v1823_v26  ;;  %v2545_v26 = vld [vmem:[#allocation10_spill] sm:$0xff] }
  0x5f   :  { %822 = vmatpush1.bf16.msra.mxu0 %v2220_v8 }
  0x60   :  { %894 = vmatpush1.bf16.msra.mxu1 %v1844_v31  ;;  %837 = vmatprep.subr.bf16.mxu0 %v1639_v56  ;;  %v2546_v31 = vld [vmem:[#allocation30_spill] sm:$0xff] }
  0x61   :  { %895 = vmatprep.subr.bf16.mxu1 %v1854_v33  ;;  %v2547_v33 = vld [vmem:[#allocation11_spill] sm:$0xff] }
  0x63   :  { %838 = vmatpush2.bf16.msra.mxu0 %v2232_v12 }
  0x64   :  { %896 = vmatpush1.bf16.msra.mxu1 %v1893_v47  ;;  %922 = vmatprep.subr.bf16.mxu0 %v1686_v1  ;;  %v103_v1 = vrot.slane %v2103_v36, %v1968_v52  ;;  %v2548_v47 = vld [vmem:[#allocation12_spill] sm:$0xff] }
  0x65   :  { %897 = vmatprep.subr.bf16.mxu1 %v1907_v55  ;;  %v2549_v55 = vld [vmem:[#allocation14_spill] sm:$0xff] }
  0x66   :  { %840 = vmatmul.mubr.bf16.vlgmr.msra.gmra.mxu0 %v1945_v44  ;;  %v2554_v44 = vld [vmem:[#allocation18_spill] sm:$0xff] }
  0x67   :  { %923 = vmatpush1.bf16.msra.mxu0 %v1697_v3  ;;  %1355 = vmatprep.mubr.msk.bf16.mxu0 %vm671_vm2, %v874_v14  ;;  %v87_v3 = vrot.slane %v2098_v57, %v1968_v52  ;;  %v2559_v57 = vld [vmem:[#allocation23_spill] sm:$0xff] }
  0x68   :  { %898 = vmatpush2.bf16.msra.mxu1 %v1914_v61  ;;  %924 = vmatprep.subr.bf16.mxu0 %v1710_v5  ;;  %v128_v5 = vpack.c.bf16 %v103_v1, %v103_v1  ;;  %v873_v61 = vpack.c.b16 %v2167_v35, %v2167_v35 }
  0x69   :  { %899 = vmatprep.subr.bf16.mxu1 %v1925_v37  ;;  %v2551_v37 = vld [vmem:[#allocation15_spill] sm:$0xff] }
  0x6b   :  { %925 = vmatpush1.bf16.msra.mxu0 %v1721_v7  ;;  %v124_v7 = vpack.c.bf16 %v87_v3, %v87_v3 }
  0x6c   :  { %900 = vmatpush2.bf16.msra.mxu1 %v1941_v42  ;;  %926 = vmatprep.subr.bf16.mxu0 %v1732_v9  ;;  %v859_v9 = vunpack.c.l.b16 %v128_v5  ;;  %v2553_v42 = vld [vmem:[#allocation17_spill] sm:$0xff] }
  0x6d   :  { %901 = vmatprep.subr.bf16.mxu1 %v1957_v46  ;;  %v2555_v46 = vld [vmem:[#allocation19_spill] sm:$0xff] }
  0x6f   :  { %927 = vmatpush1.bf16.msra.mxu0 %v1742_v11  ;;  %v2539_v11 = vld [vmem:[#allocation5_spill] sm:$0xff] }
  0x70   :  { %902 = vmatpush2.bf16.msra.mxu1 %v1974_v53  ;;  %928 = vmatprep.subr.bf16.mxu0 %v1756_v13  ;;  %v855_v13 = vunpack.c.l.b16 %v124_v7  ;;  %v2557_v53 = vld [vmem:[#allocation21_spill] sm:$0xff] }
  0x71   :  { %903 = vmatprep.subr.bf16.mxu1 %v1986_v22  ;;  %v2558_v22 = vld [vmem:[#allocation22_spill] sm:$0xff] }
  0x73   :  { %929 = vmatpush1.bf16.msra.mxu0 %v1768_v15  ;;  %v863_v15 = vrot.slane %v859_v9, 7 }
  0x74   :  { %904 = vmatpush2.bf16.msra.mxu1 %v1998_v58  ;;  %930 = vmatprep.subr.bf16.mxu0 %v1780_v18  ;;  %v2542_v18 = vld [vmem:[#allocation26_spill] sm:$0xff]  ;;  %v2560_v58 = vld [vmem:[#allocation25_spill] sm:$0xff] }
  0x75   :  { %905 = vmatprep.subr.bf16.mxu1 %v2012_v62  ;;  %v2561_v62 = vld [vmem:[#allocation27_spill] sm:$0xff] }
  0x77   :  { %931 = vmatpush1.bf16.msra.mxu0 %v1790_v20  ;;  %v864_v20 = vsel %vm264_vm1, %v863_v15, %v855_v13 }
  0x78   :  { %906 = vmatpush2.bf16.msra.mxu1 %v2024_v17  ;;  %932 = vmatprep.subr.bf16.mxu0 %v1806_v23  ;;  %v871_v23 = vpack.c.b16 %v864_v20, %v864_v20  ;;  %v2562_v17 = vld [vmem:[#allocation29_spill] sm:$0xff] }
  0x79   :  { %907 = vmatprep.subr.bf16.mxu1 %v2036_v43  ;;  %v2563_v43 = vld [vmem:[#allocation31_spill] sm:$0xff] }
  0x7b   :  { %933 = vmatpush1.bf16.msra.mxu0 %v2539_v11 }
  0x7c   :  { %908 = vmatpush2.bf16.msra.mxu1 %v2050_v59  ;;  %934 = vmatprep.subr.bf16.mxu0 %v2541_v19 }
  0x7d   :  { %909 = vmatprep.subr.bf16.mxu1 %v2540_v16 }
  0x7f   :  { %935 = vmatpush1.bf16.msra.mxu0 %v2543_v21 }
  0x80   :  { %910 = vmatpush2.bf16.msra.mxu1 %v2542_v18  ;;  %936 = vmatprep.subr.bf16.mxu0 %v2545_v26 }
  0x81   :  { %911 = vmatprep.subr.bf16.mxu1 %v2544_v24 }
  0x83   :  { %937 = vmatpush1.bf16.msra.mxu0 %v2547_v33 }
  0x84   :  { %912 = vmatpush2.bf16.msra.mxu1 %v2546_v31  ;;  %1354 = vmatprep.subr.msk.bf16.mxu0 %vm675_vm0, %v2548_v47 }
  0x85   :  { %1380 = vmatprep.subr.bf16.mxu1 %v2549_v55 }
  0x87   :  { %914 = vmatmul.mubr.bf16.vlgmr.msra.gmra.mxu1 %v871_v23  ;;  %953 = vmatpush2.bf16.msra.mxu0 %v2550_v63  ;;  %v1092_v63 = vld [vmem:[%s2481_s3 + $0x78] sm:$0xff] }
  0x88   :  { %1381 = vmatpush3.bf16.msra.mxu1 %v2551_v37  ;;  %1003 = vmatprep.subr.bf16.mxu0 %v1639_v56  ;;  %v1108_v37 = vld [vmem:[%s2482_s4 + $0x78] sm:$0xff] }
  0x89   :  { %1382 = vmatprep.subr.bf16.mxu1 %v2552_v39  ;;  %995 = vmatprep.mubr.bf16.mxu1 %v2164_v29  ;;  %v1091_v39 = vld [vmem:[%s2481_s3 + $0x70] sm:$0xff] }
  0x8a   :  { %955 = vmatmul.mubr.bf16.vlgmr.msra.gmra.mxu0 %v873_v61 }
  0x8b   :  { %1004 = vmatpush1.bf16.msra.mxu0 %v2147_v30  ;;  %1356 = vmatprep.mubr.msk.bf16.mxu0 %vm671_vm2, %v874_v14 }
  0x8c   :  { %1383 = vmatpush3.bf16.msra.mxu1 %v2553_v42  ;;  %1005 = vmatprep.subr.bf16.mxu0 %v1639_v56 }
  0x8d   :  { %1384 = vmatprep.subr.bf16.mxu1 %v2554_v44  ;;  %v1107_v44 = vld [vmem:[%s2482_s4 + $0x70] sm:$0xff] }
  0x8f   :  { %1006 = vmatpush1.bf16.msra.mxu0 %v2157_v28 }
  0x90   :  { %1385 = vmatpush3.bf16.msra.mxu1 %v2555_v46  ;;  %1007 = vmatprep.subr.bf16.mxu0 %v1639_v56  ;;  %v1090_v46 = vld [vmem:[%s2481_s3 + $0x68] sm:$0xff] }
  0x91   :  { %1386 = vmatprep.subr.bf16.mxu1 %v2556_v49 }
  0x93   :  { %1008 = vmatpush1.bf16.msra.mxu0 %v2174_v41 }
  0x94   :  { %1387 = vmatpush3.bf16.msra.mxu1 %v2557_v53  ;;  %1009 = vmatprep.subr.bf16.mxu0 %v1639_v56  ;;  %v1106_v53 = vld [vmem:[%s2482_s4 + $0x68] sm:$0xff] }
  0x95   :  { %1388 = vmatprep.subr.bf16.mxu1 %v2558_v22  ;;  %v1089_v22 = vld [vmem:[%s2481_s3 + $0x60] sm:$0xff] }
  0x97   :  { %1010 = vmatpush1.bf16.msra.mxu0 %v2184_v0 }
  0x98   :  { %1389 = vmatpush3.bf16.msra.mxu1 %v2559_v57  ;;  %1011 = vmatprep.subr.bf16.mxu0 %v1639_v56 }
  0x99   :  { %1390 = vmatprep.subr.bf16.mxu1 %v2560_v58  ;;  %v1105_v58 = vld [vmem:[%s2482_s4 + $0x60] sm:$0xff] }
  0x9b   :  { %1012 = vmatpush1.bf16.msra.mxu0 %v2193_v2 }
  0x9c   :  { %1391 = vmatpush3.bf16.msra.mxu1 %v2561_v62  ;;  %1013 = vmatprep.subr.bf16.mxu0 %v1639_v56  ;;  %v1088_v62 = vld [vmem:[%s2481_s3 + $0x58] sm:$0xff] }
  0x9d   :  { %1392 = vmatprep.subr.bf16.mxu1 %v2562_v17 }
  0x9f   :  { %1014 = vmatpush1.bf16.msra.mxu0 %v2202_v4 }
  0xa0   :  { %1393 = vmatpush3.bf16.msra.mxu1 %v2563_v43  ;;  %1015 = vmatprep.subr.bf16.mxu0 %v1639_v56 }
  0xa1   :  { %1394 = vmatprep.subr.bf16.mxu1 %v2131_v48  ;;  %v230_v48 = vld [vmem:[%s2480_s2] sm:$0x7] }
  0xa2   :  { %v235_v51 = vrot.slane %v230_v48, %v1968_v52  ;;  %v2322_v29 = vrot.slane %v230_v48, %v2565_v25  ;;  %v1099_v25 = vld [vmem:[%s2482_s4 + $0x30] sm:$0xff] }
  0xa3   :  { %1016 = vmatpush1.bf16.msra.mxu0 %v2211_v6 }
  0xa4   :  { %1395 = vmatpush3.bf16.msra.mxu1 %v2142_v38  ;;  %1017 = vmatprep.subr.bf16.mxu0 %v1639_v56  ;;  %v239_v38 = vrot.slane %v230_v48, %v2564_v27  ;;  %v1103_v48 = vld [vmem:[%s2482_s4 + $0x50] sm:$0xff] }
  0xa7   :  { %996 = vmatmul.mubr.bf16.vlgmr.msra.gmra.mxu1 %v871_v23  ;;  %1018 = vmatpush1.bf16.msra.mxu0 %v2220_v8 }
  0xa8   :  { %1033 = vmatprep.subr.bf16.mxu0 %v1639_v56 }
  0xab   :  { %1034 = vmatpush2.bf16.msra.mxu0 %v2232_v12 }
  0xae   :  { %1036 = vmatmul.mubr.bf16.vlgmr.msra.gmra.mxu0 %v873_v61  ;;  %v1640_v61 = vmov 0.0  }
  0xaf   :  { %1471 = vmatprep.subr.mxu0 %v1640_v61  ;;  %1436 = vmatprep.subr.mxu1 %v1640_v61 }
  0xb0   :  { %1472 = vmatpush3.msra.mxu0 %v1092_v63  ;;  %1437 = vmatpush3.msra.mxu1 %v1108_v37  ;;  %v1357_v63 = vld [vmem:[%s2483_s5] ss:$0 sm:$0xff] }
  0xb1   :  { %1473 = vmatprep.subr.mxu0 %v1640_v61  ;;  %1438 = vmatprep.subr.mxu1 %v1640_v61 }
  0xb2   :  { %1474 = vmatpush3.msra.mxu0 %v1091_v39  ;;  %1439 = vmatpush3.msra.mxu1 %v1107_v44 }
  0xb3   :  { %1475 = vmatprep.subr.mxu0 %v1640_v61  ;;  %1440 = vmatprep.subr.mxu1 %v1640_v61 }
  0xb4   :  { %1476 = vmatpush3.msra.mxu0 %v1090_v46  ;;  %1441 = vmatpush3.msra.mxu1 %v1106_v53 }
  0xb5   :  { %1477 = vmatprep.subr.mxu0 %v1640_v61  ;;  %1442 = vmatprep.subr.mxu1 %v1640_v61 }
  0xb6   :  { %1478 = vmatpush3.msra.mxu0 %v1089_v22  ;;  %1443 = vmatpush3.msra.mxu1 %v1105_v58 }
  0xb7   :  { %1479 = vmatprep.subr.mxu0 %v1640_v61  ;;  %1444 = vmatprep.subr.mxu1 %v1640_v61 }
  0xb8   :  { %1480 = vmatpush3.msra.mxu0 %v1088_v62  ;;  %1503 = vmatprep.mubr.msk.f32.mxu0 %vm1641_vm4, %v1640_v61 }
  0xb9   :  { %1481 = vmatprep.subr.mxu0 %v1640_v61  ;;  %1468 = vmatprep.mubr.msk.f32.mxu1 %vm1641_vm4, %v1640_v61 }
  0xe7   :  { %v760_v59 = vpop.f32.mrf.mxu1 }
  0xe9   :  { %v762_v60 = vpop.f32.mrf.mxu1 }
  0xeb   :  { %v764_v36 = vpop.f32.mrf.mxu1 }
  0xed   :  { %v765_v54 = vpop.f32.mrf.mxu1 }
 0x102   :  { %v719_v30 = vpop.f32.mrf.mxu0 }
 0x103   :  { %v720_v50 = vadd.f32 %v719_v30, %v235_v51  ;;  %v1085_v30 = vld [vmem:[%s2481_s3 + $0x40] sm:$0xff] }
 0x104   :  { %v721_v34 = vpop.f32.mrf.mxu0 }
 0x105   :  { %v722_v32 = vadd.f32 %v721_v34, %v239_v38  ;;  %v761_v28 = vadd.f32 %v760_v59, %v720_v50  ;;  %v1104_v59 = vld [vmem:[%s2482_s4 + $0x58] sm:$0xff] }
 0x106   :  { %v723_v56 = vpop.f32.mrf.mxu0  ;;  %1445 = vmatpush3.msra.mxu1 %v1104_v59 }
 0x107   :  { %v1374_v45 = vpop.f32.mrf.mxu1  ;;  %v763_v40 = vadd.f32 %v762_v60, %v722_v32  ;;  %v1087_v60 = vld [vmem:[%s2481_s3 + $0x50] sm:$0xff]  ;;  %1446 = vmatprep.subr.mxu1 %v1640_v61  ;;  %v1101_v32 = vld [vmem:[%s2482_s4 + $0x40] sm:$0xff]  ;;  %v1084_v56 = vld [vmem:[%s2481_s3 + $0x38] sm:$0xff] }
 0x108   :  { %v724_v35 = vpop.f32.mrf.mxu0  ;;  %1482 = vmatpush3.msra.mxu0 %v1087_v60  ;;  %1447 = vmatpush3.msra.mxu1 %v1103_v48 }
 0x109   :  { %v1375_v41 = vpop.f32.mrf.mxu1  ;;  %v1043_v2 = vmul.f32 %v763_v40, %v761_v28  ;;  %1483 = vmatprep.subr.mxu0 %v1640_v61  ;;  %1448 = vmatprep.subr.mxu1 %v1640_v61 }
 0x10a   :  { %v1376_v0 = vadd.f32 %v1375_v41, %v1374_v45  ;;  %v1100_v45 = vld [vmem:[%s2482_s4 + $0x38] sm:$0xff]  ;;  %v1098_v41 = vld [vmem:[%s2482_s4 + $0x28] sm:$0xff] }
 0x10b   :  { %v1377_v4 = vpop.f32.mrf.mxu1  ;;  %v1045_v52 = vsel %vm1044_vm3, %v1043_v2, 0.0  ;;  %v1097_v2 = vld [vmem:[%s2482_s4 + $0x20] sm:$0xff] }
 0x10c   :  { %v802_v6 = vadd.f32 %v1376_v0, %v2322_v29  ;;  %1046 = vadd.xlane.f32.xlu0 %v1045_v52  ;;  %v1081_v0 = vld [vmem:[%s2481_s3 + $0x20] sm:$0xff]  ;;  %v1080_v4 = vld [vmem:[%s2481_s3 + $0x18] sm:$0xff] }
 0x10d   :  { %v1378_v8 = vpop.f32.mrf.mxu1  ;;  %v1096_v52 = vld [vmem:[%s2482_s4 + $0x18] sm:$0xff] }
 0x10e   :  { %v1095_v8 = vld [vmem:[%s2482_s4 + $0x10] sm:$0xff] }
 0x126   :  { %v841_v10 = vpop.f32.mrf.mxu0 }
 0x127   :  { %v2326_v12 = vadd.f32 %v841_v10, %v802_v6  ;;  %v1079_v6 = vld [vmem:[%s2481_s3 + $0x10] sm:$0xff]  ;;  %v1078_v10 = vld [vmem:[%s2481_s3 + $0x8] sm:$0xff] }
 0x128   :  { %v843_v14 = vpop.f32.mrf.mxu0 }
 0x129   :  { %v1077_v14 = vld [vmem:[%s2481_s3] sm:$0xff] }
 0x12a   :  { %v844_v1 = vpop.f32.mrf.mxu0 }
 0x12b   :  { %v1093_v1 = vld [vmem:[%s2482_s4] sm:$0xff] }
 0x12c   :  { %v845_v3 = vpop.f32.mrf.mxu0 }
 0x147   :  { %v915_v5 = vpop.f32.mrf.mxu1 }
 0x148   :  { %v916_v7 = vadd.f32 %v915_v5, %v235_v51  ;;  %v1086_v51 = vld [vmem:[%s2481_s3 + $0x48] sm:$0xff] }
 0x149   :  { %v917_v9 = vpop.f32.mrf.mxu1  ;;  %1484 = vmatpush3.msra.mxu0 %v1086_v51 }
 0x14a   :  { %v956_v13 = vpop.f32.mrf.mxu0  ;;  %v918_v15 = vadd.f32 %v917_v9, %v239_v38  ;;  %1485 = vmatprep.subr.mxu0 %v1640_v61  ;;  %v1102_v38 = vld [vmem:[%s2482_s4 + $0x48] sm:$0xff] }
 0x14b   :  { %v919_v11 = vpop.f32.mrf.mxu1  ;;  %v957_v16 = vadd.f32 %v956_v13, %v916_v7  ;;  %1449 = vmatpush3.msra.mxu1 %v1102_v38  ;;  %1486 = vmatpush3.msra.mxu0 %v1085_v30 }
 0x14c   :  { %v958_v18 = vpop.f32.mrf.mxu0  ;;  %1450 = vmatprep.subr.mxu1 %v1640_v61  ;;  %1487 = vmatprep.subr.mxu0 %v1640_v61 }
 0x14d   :  { %v920_v19 = vpop.f32.mrf.mxu1  ;;  %v959_v21 = vadd.f32 %v958_v18, %v918_v15  ;;  %v1052_v20 = vmul.f32 %v957_v16, %v763_v40  ;;  %1451 = vmatpush3.msra.mxu1 %v1101_v32  ;;  %1488 = vmatpush3.msra.mxu0 %v1084_v56  ;;  %v1083_v40 = vld [vmem:[%s2481_s3 + $0x30] sm:$0xff] }
 0x14e   :  { %v960_v24 = vpop.f32.mrf.mxu0  ;;  %1452 = vmatprep.subr.mxu1 %v1640_v61  ;;  %1489 = vmatprep.subr.mxu0 %v1640_v61 }
 0x14f   :  { %v1053_v26 = vsel %vm1044_vm3, %v1052_v20, 0.0  ;;  %v1048_v23 = vmul.f32 %v959_v21, %v761_v28  ;;  %v1056_v31 = vmul.f32 %v959_v21, %v957_v16  ;;  %1453 = vmatpush3.msra.mxu1 %v1100_v45  ;;  %1490 = vmatpush3.msra.mxu0 %v1083_v40 }
 0x150   :  { %v961_v33 = vpop.f32.mrf.mxu0  ;;  %1054 = vadd.xlane.f32.xlu1 %v1053_v26  ;;  %1454 = vmatprep.subr.mxu1 %v1640_v61 }
 0x151   :  { %v1049_v47 = vsel %vm1044_vm3, %v1048_v23, 0.0  ;;  %v1057_v55 = vsel %vm1044_vm3, %v1056_v31, 0.0  ;;  %1491 = vmatprep.subr.mxu0 %v1640_v61  ;;  %1455 = vmatpush3.msra.mxu1 %v1099_v25 }
 0x152   :  { %1050 = vadd.xlane.f32.xlu0 %v1049_v47  ;;  %1456 = vmatprep.subr.mxu1 %v1640_v61 }
 0x153   :  { %1457 = vmatpush3.msra.mxu1 %v1098_v41 }
 0x154   :  { %1058 = vadd.xlane.f32.xlu1 %v1057_v55  ;;  %1458 = vmatprep.subr.mxu1 %v1640_v61 }
 0x155   :  { %1459 = vmatpush3.msra.mxu1 %v1097_v2 }
 0x156   :  { %1460 = vmatprep.subr.mxu1 %v1640_v61 }
 0x157   :  { %1461 = vmatpush3.msra.mxu1 %v1096_v52 }
 0x158   :  { %1462 = vmatprep.subr.mxu1 %v1640_v61 }
 0x159   :  { %1463 = vmatpush3.msra.mxu1 %v1095_v8 }
 0x15a   :  { %1464 = vmatprep.subr.mxu1 %v1640_v61 }
 0x167   :  { %v1396_v42 = vpop.f32.mrf.mxu1 }
 0x169   :  { %v1397_v49 = vpop.f32.mrf.mxu1 }
 0x16a   :  { %v1398_v57 = vadd.f32 %v1397_v49, %v1396_v42 }
 0x16b   :  { %v1399_v17 = vpop.f32.mrf.mxu1 }
 0x16c   :  { %v998_v43 = vadd.f32 %v1398_v57, %v2322_v29  ;;  %v1082_v29 = vld [vmem:[%s2481_s3 + $0x28] sm:$0xff] }
 0x16d   :  { %v1400_v36 = vpop.f32.mrf.mxu1  ;;  %1492 = vmatpush3.msra.mxu0 %v1082_v29 }
 0x16e   :  { %v1037_v54 = vpop.f32.mrf.mxu0  ;;  %1493 = vmatprep.subr.mxu0 %v1640_v61 }
 0x16f   :  { %v2384_v27 = vadd.f32 %v1037_v54, %v998_v43  ;;  %1494 = vmatpush3.msra.mxu0 %v1081_v0 }
 0x170   :  { %v1039_v50 = vpop.f32.mrf.mxu0  ;;  %1495 = vmatprep.subr.mxu0 %v1640_v61 }
 0x171   :  { %v2396_v34 = vsub.f32 %v2326_v12, %v2384_v27  ;;  %1496 = vmatpush3.msra.mxu0 %v1080_v4  ;;  %v1094_v12 = vld [vmem:[%s2482_s4 + $0x8] sm:$0xff] }
 0x172   :  { %v1040_v28 = vpop.f32.mrf.mxu0  ;;  %1497 = vmatprep.subr.mxu0 %v1640_v61  ;;  %1465 = vmatpush3.msra.mxu1 %v1094_v12 }
 0x173   :  { %1498 = vmatpush3.msra.mxu0 %v1079_v6  ;;  %1466 = vmatprep.subr.mxu1 %v1640_v61 }
 0x174   :  { %v1041_v35 = vpop.f32.mrf.mxu0  ;;  %1499 = vmatprep.subr.mxu0 %v1640_v61  ;;  %1467 = vmatpush3.msra.mxu1 %v1093_v1 }
 0x175   :  { %1500 = vmatpush3.msra.mxu0 %v1078_v10 }
 0x176   :  { %1501 = vmatprep.subr.mxu0 %v1640_v61 }
 0x177   :  { %1502 = vmatpush3.msra.mxu0 %v1077_v14 }
 0x195   :  { %v1047_v3 = vpop.xlane.xlu0 %1046 }
 0x1d9   :  { %v1055_v5 = vpop.xlane.xlu1 %1054 }
 0x1db   :  { %v1051_v7 = vpop.xlane.xlu0 %1050 }
 0x1dc   :  { %v1060_v9 = vsub.f32 %v1051_v7, %v1047_v3 }
 0x1dd   :  { %v1059_v11 = vpop.xlane.xlu1 %1058 }
 0x1de   :  { %v1061_v13 = vmul.f32 1.442695, %v1060_v9  ;;  %v1066_v15 = vsub.f32 %v1059_v11, %v1055_v5 }
 0x1e0   :  { %1609 = vpow2.f32 %v1061_v13  ;;  %v1067_v16 = vmul.f32 1.442695, %v1066_v15 }
 0x1e2   :  { %1611 = vpow2.f32 %v1067_v16 }
 0x1ed   :  { %v1610_v19 = vpop.eup %1609 }
 0x1ee   :  { %v1063_v18 = vadd.f32 1.0, %v1610_v19 }
 0x1ef   :  { %v1612_v21 = vpop.eup %1611 }
 0x1f0   :  { %1613 = vrcp.f32 %v1063_v18  ;;  %v1069_v20 = vadd.f32 1.0, %v1612_v21 }
 0x1f2   :  { %1615 = vrcp.f32 %v1069_v20 }
 0x1fd   :  { %v1614_v24 = vpop.eup %1613 }
 0x1fe   :  { %v1073_v26 = vmul.f32 %v1614_v24, %v2396_v34 }
 0x1ff   :  { %v1616_v23 = vpop.eup %1615 }
 0x200   :  { %v1074_v31 = vadd.f32 %v1073_v26, %v2384_v27  ;;  %v1075_v33 = vmul.f32 %v1616_v23, %v2396_v34 }
 0x202   :  { %1504 = vmatmul.mubr.f32.vlgmr.msra.gmra.mxu0 %v1074_v31  ;;  %v1076_v47 = vadd.f32 %v1075_v33, %v2384_v27 }
 0x204   :  { %1469 = vmatmul.mubr.f32.vlgmr.msra.gmra.mxu1 %v1076_v47 }
 0x2c2   :  { %v1245_v55 = vpop.f32.mrf.mxu0 }
 0x2c4   :  { %v1175_v61 = vpop.f32.mrf.mxu1  ;;  %v1505_v37 = vpop.f32.mrf.mxu0 }
 0x2c5   :  { %v1246_v39 = vadd.f32 %v1245_v55, %v1175_v61 }
 0x2c6   :  { %v1470_v42 = vpop.f32.mrf.mxu1 }
 0x2c7   :  { %v1256_v44 = vadd.f32 %v1357_v63, %v1246_v39 }
 0x2c9   :  { %1258 = vst.msk [vmem:[#allocation2] sm:$0x3] %vm1257_vm5, %v1256_v44 }
 0x2ca   :  { %1628 = shalt.err (!%p1625_p4)
}
 0x2cb   :  { %1268 = dma.vmem_to_hbm [thread:$0]  %s1266_s18, 32, %s2484_s6, [#allocation3]  }
 0x2cc   :  { %1637 = dma.done.wait [#allocation3], 32  }
 0x2cd   :  { %1638 = vsyncadd [#allocation3], 4294967264 }
 0x2ce   :  { %1272 = vsyncpa [#allocation3], 1 }

</bundles_post_ra>
